<compile_context>
chip_gen: v7x
topology: tpu7x:2x2x1
jax: 0.10.0
libtpu: 0.0.40
codegen_flags: <defaults>
</compile_context>

<pallas_src>
import functools

import jax
import jax.numpy as jnp
from jax.experimental import pallas as pl
from jax.experimental.pallas import tpu as pltpu


def _round_up(x, m):
    return ((x + m - 1) // m) * m


# ----------------------------------------------------------------------------
# Pallas kernel: fused 3-layer MLP  (Linear + ReLU, Linear + ReLU, Linear)
# ----------------------------------------------------------------------------
def _bc_mlp_kernel(x_ref, w1_ref, b1_ref, w2_ref, b2_ref, w3_ref, b3_ref,
                   out_ref):
    # x tile: (tb, state_dim) f32. Matmul operands go to bf16 (MXU-native on
    # all generations); accumulation stays f32 via preferred_element_type.
    x = x_ref[...].astype(jnp.bfloat16)

    # Layer 1: Linear + ReLU  (MXU matmul; VPU bias+ReLU in f32)
    h1 = jnp.dot(x, w1_ref[...], preferred_element_type=jnp.float32)
    h1 = jnp.maximum(h1 + b1_ref[...], 0.0)

    # Layer 2: Linear + ReLU
    h2 = jnp.dot(h1.astype(jnp.bfloat16), w2_ref[...],
                 preferred_element_type=jnp.float32)
    h2 = jnp.maximum(h2 + b2_ref[...], 0.0)

    # Output layer: Linear (no activation). N is padded to a 128-lane multiple
    # (done once at param-prep time), so this writes a full-width tile ->
    # unmasked vector stores.
    y = jnp.dot(h2.astype(jnp.bfloat16), w3_ref[...],
                preferred_element_type=jnp.float32)
    out_ref[...] = (y + b3_ref[...]).astype(out_ref.dtype)


# ----------------------------------------------------------------------------
# One-time parameter preparation (hoisted out of the per-call hot path):
# pad the output layer to a 128-lane multiple and cast matmul weights to bf16.
# ----------------------------------------------------------------------------
def prepare_bc_policy_params(params):
    w1, b1 = params["w1"], params["b1"]
    w2, b2 = params["w2"], params["b2"]
    w3, b3 = params["w3"], params["b3"]
    action_dim = w3.shape[1]
    n_pad = _round_up(action_dim, 128)
    if n_pad != action_dim:
        w3 = jnp.pad(w3, ((0, 0), (0, n_pad - action_dim)))
        b3 = jnp.pad(jnp.reshape(b3, (1, -1)), ((0, 0), (0, n_pad - action_dim)))
    return {
        "w1": w1.astype(jnp.bfloat16),
        "b1": jnp.reshape(b1, (1, -1)).astype(jnp.float32),
        "w2": w2.astype(jnp.bfloat16),
        "b2": jnp.reshape(b2, (1, -1)).astype(jnp.float32),
        "w3": w3.astype(jnp.bfloat16),
        "b3": jnp.reshape(b3, (1, -1)).astype(jnp.float32),
    }


def _batch_tiling(B, batch_tile, megacore_min_batch):
    """Even-split batch tiling.

    Small batches: a single tile (no per-step pipeline overhead).
    Batches >= megacore_min_batch: at least 2 evenly sized tiles, so the
    'parallel' grid axis keeps both v7x TensorCores busy and no tile is
    dominated by zero padding.
    """
    B8 = _round_up(B, 8)
    num_tiles = pl.cdiv(B8, batch_tile)
    if B8 >= megacore_min_batch:
        num_tiles = max(num_tiles, 2)
    tb = _round_up(pl.cdiv(B8, num_tiles), 8)
    return tb, num_tiles * tb, num_tiles


def bc_policy_forward(state, prepared, action_dim, *, batch_tile=1024,
                      megacore_min_batch=512):
    """Forward pass of BCPolicy.

    state: (batch, state_dim) or (state_dim,) float32
    prepared: dict from prepare_bc_policy_params (bf16 weights, padded layer 3)
    action_dim: real (unpadded) action dimension (static Python int)
    """
    squeeze_output = state.ndim == 1
    if squeeze_output:
        state = state[None, :]
    state = state.astype(jnp.float32)

    B, state_dim = state.shape
    w1, b1 = prepared["w1"], prepared["b1"]
    w2, b2 = prepared["w2"], prepared["b2"]
    w3, b3 = prepared["w3"], prepared["b3"]
    h1 = w1.shape[1]
    h2 = w2.shape[1]
    n_pad = w3.shape[1]

    # ---- batch tiling (K is NOT padded; K == full array dim is legal) ----
    tb, B_pad, num_tiles = _batch_tiling(B, batch_tile, megacore_min_batch)
    if B_pad != B:
        state = jnp.pad(state, ((0, B_pad - B), (0, 0)))
    grid = (num_tiles,)

    # Advisory cost estimate so XLA can overlap this small custom call.
    flops = 2 * B_pad * (state_dim * h1 + h1 * h2 + h2 * n_pad)
    bytes_accessed = (4 * B_pad * (state_dim + n_pad)           # x + out (f32)
                      + 2 * (state_dim * h1 + h1 * h2 + h2 * n_pad)  # bf16 W
                      + 4 * (h1 + h2 + n_pad))                  # f32 biases
    cost = pl.CostEstimate(flops=flops, transcendentals=0,
                           bytes_accessed=bytes_accessed)

    out = pl.pallas_call(
        _bc_mlp_kernel,
        out_shape=jax.ShapeDtypeStruct((B_pad, n_pad), jnp.float32),
        grid_spec=pltpu.PrefetchScalarGridSpec(
            num_scalar_prefetch=0,
            grid=grid,
            in_specs=[
                pl.BlockSpec((tb, state_dim), lambda i: (i, 0)),   # x tile (unpadded K)
                pl.BlockSpec((state_dim, h1), lambda i: (0, 0)),   # w1 (resident, bf16)
                pl.BlockSpec((1, h1), lambda i: (0, 0)),           # b1
                pl.BlockSpec((h1, h2), lambda i: (0, 0)),          # w2 (resident, bf16)
                pl.BlockSpec((1, h2), lambda i: (0, 0)),           # b2
                pl.BlockSpec((h2, n_pad), lambda i: (0, 0)),       # w3 (padded N, bf16)
                pl.BlockSpec((1, n_pad), lambda i: (0, 0)),        # b3 (padded N)
            ],
            out_specs=pl.BlockSpec((tb, n_pad), lambda i: (i, 0)),
        ),
        compiler_params=pltpu.CompilerParams(
            dimension_semantics=("parallel",)),
        cost_estimate=cost,
    )(state, w1, b1, w2, b2, w3, b3)

    out = out[:B, :action_dim]
    if squeeze_output:
        out = out[0]
    return out


# ----------------------------------------------------------------------------
# Deterministic parameter init (matches BCPolicy.__init__ semantics:
# xavier_uniform_ weights, zero biases). Weights stored as (in, out) == W.T.
# ----------------------------------------------------------------------------
def xavier_uniform(key, fan_in, fan_out):
    bound = jnp.sqrt(6.0 / (fan_in + fan_out))
    return jax.random.uniform(key, (fan_in, fan_out), jnp.float32,
                              minval=-bound, maxval=bound)


def init_bc_policy_params(key, state_dim, action_dim, hidden_sizes):
    ks = jax.random.split(key, len(hidden_sizes) + 1)
    dims = [state_dim] + list(hidden_sizes) + [action_dim]
    params = {}
    for idx in range(len(dims) - 1):
        fan_in, fan_out = dims[idx], dims[idx + 1]
        params[f"w{idx + 1}"] = xavier_uniform(ks[idx], fan_in, fan_out)
        params[f"b{idx + 1}"] = jnp.zeros((1, fan_out), jnp.float32)
    return params


def bc_policy_reference(state, params, matmul_dtype=jnp.float32):
    """Plain-JAX reference of the same forward pass (for validation).

    matmul_dtype=jnp.bfloat16 mirrors the kernel's bf16-operand / f32-accum
    matmuls exactly; jnp.float32 gives the full-precision reference.
    """
    squeeze_output = state.ndim == 1
    if squeeze_output:
        state = state[None, :]
    state = state.astype(jnp.float32)

    def dense(x, w, b):
        y = jnp.dot(x.astype(matmul_dtype), w.astype(matmul_dtype),
                    preferred_element_type=jnp.float32)
        return y + b.reshape(1, -1)

    h = jnp.maximum(dense(state, params["w1"], params["b1"]), 0.0)
    h = jnp.maximum(dense(h, params["w2"], params["b2"]), 0.0)
    y = dense(h, params["w3"], params["b3"])
    if squeeze_output:
        y = y[0]
    return y


if __name__ == "__main__":
    # Small shapes consistent with the module defaults:
    # hidden_sizes=[256, 256], relu activation; state_dim=32, action_dim=8.
    batch = 8
    state_dim = 32
    action_dim = 8
    hidden_sizes = [256, 256]

    key = jax.random.PRNGKey(0)
    pkey, xkey = jax.random.split(key)
    params = init_bc_policy_params(pkey, state_dim, action_dim, hidden_sizes)
    prepared = prepare_bc_policy_params(params)   # one-time pad + bf16 cast
    state = jax.random.normal(xkey, (batch, state_dim), jnp.float32)

    fwd = jax.jit(functools.partial(bc_policy_forward, action_dim=action_dim))
    action = jax.block_until_ready(fwd(state, prepared))
    assert action.shape == (batch, action_dim)

    # Validate: tight tolerance vs. a reference using the same bf16-operand /
    # f32-accum matmuls, plus a coarse sanity check vs. the full-f32 reference.
    ref_matched = bc_policy_reference(state, params, matmul_dtype=jnp.bfloat16)
    ref_f32 = bc_policy_reference(state, params)
    assert jnp.allclose(action, ref_matched, atol=1e-3, rtol=1e-3), \
        "mismatch vs bf16-matched reference"
    assert jnp.allclose(action, ref_f32, atol=1e-1, rtol=1e-1), \
        "mismatch vs f32 reference"

    # Also exercise the 1-D (single state) path, mirroring the PyTorch squeeze.
    single = jax.block_until_ready(
        bc_policy_forward(state[0], prepared, action_dim))
    assert single.shape == (action_dim,)
    assert jnp.allclose(single, ref_matched[0], atol=1e-3, rtol=1e-3)

    # Exercise the multi-tile (grid >= 2, even-split) path with a larger batch.
    big_state = jax.random.normal(jax.random.PRNGKey(1), (600, state_dim),
                                  jnp.float32)
    big = jax.block_until_ready(fwd(big_state, prepared))
    big_ref = bc_policy_reference(big_state, params, matmul_dtype=jnp.bfloat16)
    assert big.shape == (600, action_dim)
    assert jnp.allclose(big, big_ref, atol=1e-3, rtol=1e-3)

    print("KERNEL_OK")
</pallas_src>

<mosaic_0001>
module attributes {stable_mosaic.version = 11 : i64} {
  func.func @_bc_mlp_kernel(%arg0: i32, %arg1: memref<8x32xf32, #tpu.memory_space<vmem>>, %arg2: memref<32x256xbf16, #tpu.memory_space<vmem>>, %arg3: memref<1x256xf32, #tpu.memory_space<vmem>>, %arg4: memref<256x256xbf16, #tpu.memory_space<vmem>>, %arg5: memref<1x256xf32, #tpu.memory_space<vmem>>, %arg6: memref<256x128xbf16, #tpu.memory_space<vmem>>, %arg7: memref<1x128xf32, #tpu.memory_space<vmem>>, %arg8: memref<8x128xf32, #tpu.memory_space<vmem>>) attributes {dimension_semantics = [#tpu.dimension_semantics<parallel>], iteration_bounds = array<i64: 1>, scalar_prefetch = 0 : i64, scratch_operands = 0 : i64, tpu.core_type = #tpu.core_type<tc>, window_params = [{transform_indices = @transform_0, window_bounds = array<i64: 8, 32>}, {pipeline_mode = #tpu.pipeline_mode<synchronous>, transform_indices = @transform_1, window_bounds = array<i64: 32, 256>}, {pipeline_mode = #tpu.pipeline_mode<synchronous>, transform_indices = @transform_2, window_bounds = array<i64: 1, 256>}, {pipeline_mode = #tpu.pipeline_mode<synchronous>, transform_indices = @transform_3, window_bounds = array<i64: 256, 256>}, {pipeline_mode = #tpu.pipeline_mode<synchronous>, transform_indices = @transform_4, window_bounds = array<i64: 1, 256>}, {pipeline_mode = #tpu.pipeline_mode<synchronous>, transform_indices = @transform_5, window_bounds = array<i64: 256, 128>}, {pipeline_mode = #tpu.pipeline_mode<synchronous>, transform_indices = @transform_6, window_bounds = array<i64: 1, 128>}, {transform_indices = @transform_7, window_bounds = array<i64: 8, 128>}]} {
    %c0 = arith.constant 0 : index
    %c0_0 = arith.constant 0 : index
    %0 = vector.load %arg1[%c0, %c0_0] : memref<8x32xf32, #tpu.memory_space<vmem>>, vector<8x32xf32>
    %1 = arith.truncf %0 : vector<8x32xf32> to vector<8x32xbf16>
    %c0_1 = arith.constant 0 : index
    %c0_2 = arith.constant 0 : index
    %2 = vector.load %arg2[%c0_1, %c0_2] : memref<32x256xbf16, #tpu.memory_space<vmem>>, vector<32x256xbf16>
    %cst = arith.constant dense<0.000000e+00> : vector<8x256xf32>
    %3 = tpu.matmul %1, %2, %cst {dimension_numbers = #tpu.dot_dimension_numbers<[1], [0], [0], [1], [0, 0, 1, 1], [], []>} : vector<8x32xbf16>, vector<32x256xbf16>, vector<8x256xf32> -> vector<8x256xf32>
    %c0_3 = arith.constant 0 : index
    %c0_4 = arith.constant 0 : index
    %4 = vector.load %arg3[%c0_3, %c0_4] : memref<1x256xf32, #tpu.memory_space<vmem>>, vector<1x256xf32>
    %5 = vector.broadcast %4 : vector<1x256xf32> to vector<8x256xf32>
    %6 = arith.addf %3, %5 : vector<8x256xf32>
    %cst_5 = arith.constant 0.000000e+00 : f32
    %7 = vector.broadcast %cst_5 : f32 to vector<8x256xf32>
    %8 = arith.maximumf %6, %7 : vector<8x256xf32>
    %9 = arith.truncf %8 : vector<8x256xf32> to vector<8x256xbf16>
    %c0_6 = arith.constant 0 : index
    %c0_7 = arith.constant 0 : index
    %10 = vector.load %arg4[%c0_6, %c0_7] : memref<256x256xbf16, #tpu.memory_space<vmem>>, vector<256x256xbf16>
    %cst_8 = arith.constant dense<0.000000e+00> : vector<8x256xf32>
    %11 = tpu.matmul %9, %10, %cst_8 {dimension_numbers = #tpu.dot_dimension_numbers<[1], [0], [0], [1], [0, 0, 1, 1], [], []>} : vector<8x256xbf16>, vector<256x256xbf16>, vector<8x256xf32> -> vector<8x256xf32>
    %c0_9 = arith.constant 0 : index
    %c0_10 = arith.constant 0 : index
    %12 = vector.load %arg5[%c0_9, %c0_10] : memref<1x256xf32, #tpu.memory_space<vmem>>, vector<1x256xf32>
    %13 = vector.broadcast %12 : vector<1x256xf32> to vector<8x256xf32>
    %14 = arith.addf %11, %13 : vector<8x256xf32>
    %cst_11 = arith.constant 0.000000e+00 : f32
    %15 = vector.broadcast %cst_11 : f32 to vector<8x256xf32>
    %16 = arith.maximumf %14, %15 : vector<8x256xf32>
    %17 = arith.truncf %16 : vector<8x256xf32> to vector<8x256xbf16>
    %c0_12 = arith.constant 0 : index
    %c0_13 = arith.constant 0 : index
    %18 = vector.load %arg6[%c0_12, %c0_13] : memref<256x128xbf16, #tpu.memory_space<vmem>>, vector<256x128xbf16>
    %cst_14 = arith.constant dense<0.000000e+00> : vector<8x128xf32>
    %19 = tpu.matmul %17, %18, %cst_14 {dimension_numbers = #tpu.dot_dimension_numbers<[1], [0], [0], [1], [0, 0, 1, 1], [], []>} : vector<8x256xbf16>, vector<256x128xbf16>, vector<8x128xf32> -> vector<8x128xf32>
    %c0_15 = arith.constant 0 : index
    %c0_16 = arith.constant 0 : index
    %20 = vector.load %arg7[%c0_15, %c0_16] : memref<1x128xf32, #tpu.memory_space<vmem>>, vector<1x128xf32>
    %21 = vector.broadcast %20 : vector<1x128xf32> to vector<8x128xf32>
    %22 = arith.addf %19, %21 : vector<8x128xf32>
    %c0_17 = arith.constant 0 : index
    %c0_18 = arith.constant 0 : index
    %23 = vector.load %arg8[%c0_17, %c0_18] : memref<8x128xf32, #tpu.memory_space<vmem>>, vector<8x128xf32>
    tpu.vector_store %arg8[%c0_17, %c0_18], %22 {strides = array<i32>} : memref<8x128xf32, #tpu.memory_space<vmem>>, vector<8x128xf32>,
    return
  }
  func.func @transform_0(%arg0: i32) -> (i32, i32) {
    %c0_i32 = arith.constant 0 : i32
    %c0_i32_0 = arith.constant 0 : i32
    return %arg0, %c0_i32 : i32, i32
  }
  func.func @transform_1(%arg0: i32) -> (i32, i32) {
    %c0_i32 = arith.constant 0 : i32
    %c0_i32_0 = arith.constant 0 : i32
    %c0_i32_1 = arith.constant 0 : i32
    return %c0_i32, %c0_i32_0 : i32, i32
  }
  func.func @transform_2(%arg0: i32) -> (i32, i32) {
    %c0_i32 = arith.constant 0 : i32
    %c0_i32_0 = arith.constant 0 : i32
    %c0_i32_1 = arith.constant 0 : i32
    return %c0_i32, %c0_i32_0 : i32, i32
  }
  func.func @transform_3(%arg0: i32) -> (i32, i32) {
    %c0_i32 = arith.constant 0 : i32
    %c0_i32_0 = arith.constant 0 : i32
    %c0_i32_1 = arith.constant 0 : i32
    return %c0_i32, %c0_i32_0 : i32, i32
  }
  func.func @transform_4(%arg0: i32) -> (i32, i32) {
    %c0_i32 = arith.constant 0 : i32
    %c0_i32_0 = arith.constant 0 : i32
    %c0_i32_1 = arith.constant 0 : i32
    return %c0_i32, %c0_i32_0 : i32, i32
  }
  func.func @transform_5(%arg0: i32) -> (i32, i32) {
    %c0_i32 = arith.constant 0 : i32
    %c0_i32_0 = arith.constant 0 : i32
    %c0_i32_1 = arith.constant 0 : i32
    return %c0_i32, %c0_i32_0 : i32, i32
  }
  func.func @transform_6(%arg0: i32) -> (i32, i32) {
    %c0_i32 = arith.constant 0 : i32
    %c0_i32_0 = arith.constant 0 : i32
    %c0_i32_1 = arith.constant 0 : i32
    return %c0_i32, %c0_i32_0 : i32, i32
  }
  func.func @transform_7(%arg0: i32) -> (i32, i32) {
    %c0_i32 = arith.constant 0 : i32
    %c0_i32_0 = arith.constant 0 : i32
    return %arg0, %c0_i32 : i32, i32
  }
}

</mosaic_0001>

<bundles_post_ra>
// kernel: bc_policy_forward.1
= control target key start
LH: loop header
LB: loop body
LE: loop exit
PB: predicated region body
PF: predicated region fallthrough
CT: control target
= control target key end

     0   :  { %12 = vsyncpa [#allocation3], 0  ;;  %s1009_s0 = inlined_call_operand.hbm [shape: f32[8,32], index: 0, kind: input, shape index: {}]   ;;  %s1010_s1 = inlined_call_operand.hbm [shape: bf16[32,256], index: 1, kind: input, shape index: {}]   ;;  %s1011_s2 = inlined_call_operand.vmem [shape: f32[1,256], index: 2, kind: input, shape index: {}]   ;;  %s1012_s3 = inlined_call_operand.hbm [shape: bf16[256,256], index: 3, kind: input, shape index: {}]   ;;  %s1013_s4 = inlined_call_operand.vmem [shape: f32[1,256], index: 4, kind: input, shape index: {}]   ;;  %s1014_s5 = inlined_call_operand.hbm [shape: bf16[256,128], index: 5, kind: input, shape index: {}]   ;;  %s1015_s6 = inlined_call_operand.vmem [shape: f32[1,128], index: 6, kind: input, shape index: {}]   ;;  %s1016_s7 = inlined_call_operand.hbm [shape: f32[8,128], index: 7, kind: output, shape index: {}]  }
   0x1   :  { %13 = vsyncpa [#allocation6], 0 }
   0x2   :  { %14 = vsyncpa [#allocation9], 0 }
   0x3   :  { %15 = vsyncpa [#allocation4], 0  ;;  %s884_s24 = smov [#allocation5]   ;;  %s766_s28 = scalar_lea.hbm %s1010_s1, 512 }
   0x4   :  { %s31_s25 = sshll.u32 %s884_s24, 4  ;;  %p767_p0 = scmp.ne.s32.totalorder %s1010_s1, %s766_s28  ;;  %s32_s25 = int_to_ptr.vmem [resolvable:$true] %s31_s25 }
   0x5   :  { %p770_p1 = scmp.lt.u32.totalorder %s766_s28, %s1010_s1 }
   0x7   :  { %p772_p2 = pnand %p770_p1, %p767_p0 }
   0x9   :  { %775 = shalt.err (!%p772_p2)
}
   0xa   :  { %s776_s10 = scalar_lea.vmem %s32_s25, 512  ;;  %p781_p4 = scmp.lt.s32.totalorder %s32_s25, %s32_s25 }
   0xb   :  { %p777_p3 = scmp.ne.s32.totalorder %s32_s25, %s776_s10  ;;  %p782_p5 = scmp.lt.s32.totalorder %s776_s10, %s776_s10 }
   0xd   :  { %p783_p6 = por %p782_p5, %p781_p4 }
   0xf   :  { %p784_p7 = pnand %p783_p6, %p777_p3 }
  0x11   :  { %787 = shalt.err (!%p784_p7)
}
  0x12   :  { %s885_s11 = smov 128   ;;  %s886_s12 = smov 8  }
  0x13   :  { %37 = dma.hbm_to_vmem [thread:$0]  %s1010_s1, 512, %s32_s25, [#allocation6], %s885_s11, %s885_s11, %s886_s12  }
  0x14   :  { %s887_s15 = smov [#allocation2]   ;;  %s888_s17 = smov [#allocation7]  }
  0x15   :  { %s22_s16 = sshll.u32 %s887_s15, 4  ;;  %s45_s18 = sshll.u32 %s888_s17, 4  ;;  %s23_s16 = int_to_ptr.vmem [resolvable:$true] %s22_s16  ;;  %s46_s18 = int_to_ptr.vmem [resolvable:$true] %s45_s18 }
  0x16   :  { %s788_s21 = scalar_lea.hbm %s1009_s0, 128 }
  0x17   :  { %p789_p8 = scmp.ne.s32.totalorder %s1009_s0, %s788_s21  ;;  %p792_p9 = scmp.lt.u32.totalorder %s788_s21, %s1009_s0 }
  0x19   :  { %p794_p10 = pnand %p792_p9, %p789_p8 }
  0x1b   :  { %797 = shalt.err (!%p794_p10)
}
  0x1c   :  { %s798_s1 = scalar_lea.vmem %s23_s16, 128  ;;  %p803_p12 = scmp.lt.s32.totalorder %s23_s16, %s23_s16 }
  0x1d   :  { %p799_p11 = scmp.ne.s32.totalorder %s23_s16, %s798_s1  ;;  %p804_p13 = scmp.lt.s32.totalorder %s798_s1, %s798_s1 }
  0x1f   :  { %p805_p0 = por %p804_p13, %p803_p12 }
  0x21   :  { %p806_p1 = pnand %p805_p0, %p799_p11 }
  0x23   :  { %809 = shalt.err (!%p806_p1)
}
  0x24   :  { %25 = dma.hbm_to_vmem [thread:$0]  %s1009_s0, 128, %s23_s16, [#allocation3]  }
  0x25   :  { %s810_s30 = scalar_lea.hbm %s1012_s3, 4096 }
  0x26   :  { %p811_p2 = scmp.ne.s32.totalorder %s1012_s3, %s810_s30  ;;  %p814_p3 = scmp.lt.u32.totalorder %s810_s30, %s1012_s3 }
  0x28   :  { %p816_p4 = pnand %p814_p3, %p811_p2 }
  0x2a   :  { %819 = shalt.err (!%p816_p4)
}
  0x2b   :  { %s820_s14 = scalar_lea.vmem %s46_s18, 4096  ;;  %p825_p6 = scmp.lt.s32.totalorder %s46_s18, %s46_s18 }
  0x2c   :  { %p821_p5 = scmp.ne.s32.totalorder %s46_s18, %s820_s14  ;;  %p826_p7 = scmp.lt.s32.totalorder %s820_s14, %s820_s14 }
  0x2e   :  { %p827_p8 = por %p826_p7, %p825_p6 }
  0x30   :  { %p828_p9 = pnand %p827_p8, %p821_p5 }
  0x32   :  { %831 = shalt.err (!%p828_p9)
}
  0x33   :  { %51 = dma.hbm_to_vmem [thread:$0]  %s1012_s3, 4096, %s46_s18, [#allocation6], %s885_s11, %s885_s11, %s886_s12  }
  0x34   :  { %s889_s16 = smov [#allocation8]   ;;  %s832_s21 = scalar_lea.hbm %s1014_s5, 2048 }
  0x35   :  { %s59_s17 = sshll.u32 %s889_s16, 4  ;;  %p833_p10 = scmp.ne.s32.totalorder %s1014_s5, %s832_s21  ;;  %s60_s17 = int_to_ptr.vmem [resolvable:$true] %s59_s17 }
  0x36   :  { %p836_p11 = scmp.lt.u32.totalorder %s832_s21, %s1014_s5 }
  0x38   :  { %p838_p12 = pnand %p836_p11, %p833_p10 }
  0x3a   :  { %841 = shalt.err (!%p838_p12)
}
  0x3b   :  { %s842_s1 = scalar_lea.vmem %s60_s17, 2048  ;;  %p847_p0 = scmp.lt.s32.totalorder %s60_s17, %s60_s17 }
  0x3c   :  { %p843_p13 = scmp.ne.s32.totalorder %s60_s17, %s842_s1  ;;  %p848_p1 = scmp.lt.s32.totalorder %s842_s1, %s842_s1 }
  0x3e   :  { %p849_p2 = por %p848_p1, %p847_p0 }
  0x40   :  { %p850_p3 = pnand %p849_p2, %p843_p13 }
  0x42   :  { %853 = shalt.err (!%p850_p3)
}
  0x43   :  { %s890_s3 = smov 64   ;;  %s891_s11 = smov 4  }
  0x44   :  { %65 = dma.hbm_to_vmem [thread:$0]  %s1014_s5, 2048, %s60_s17, [#allocation9], %s890_s3, %s890_s3, %s891_s11  }
  0x45   :  { %876 = dma.done.wait [#allocation3], 128  }
  0x46   :  { %877 = vsyncadd [#allocation3], 4294967168 }
  0x47   :  { %878 = dma.done.wait [#allocation6], 4608  }
  0x48   :  { %879 = vsyncadd [#allocation6], 4294962688 }
  0x49   :  { %880 = dma.done.wait [#allocation9], 2048  }
  0x4a   :  { %881 = vsyncadd [#allocation9], 4294965248  ;;  %v892_v0 = vmov 0   ;;  %v696_v1 = vld [vmem:[#allocation5 + $0x4] ss:$8 sps:$4 sm:$0xff]   ;;  %v81_v5 = vld [vmem:[#allocation2] sm:$0xff]  ;;  %v89_v51 = vlaneseq }
  0x4b   :  { %155 = vmatprep.mubr.bf16.mxu0 %v892_v0  ;;  %v698_v2 = vld [vmem:[#allocation5] ss:$8 sps:$4 sm:$0xff]   ;;  %123 = vmatprep.subr.bf16.mxu0 %v696_v1  ;;  %v699_v3 = vld [vmem:[#allocation5 + $0x14] ss:$8 sps:$4 sm:$0xff]   ;;  %v701_v4 = vld [vmem:[#allocation5 + $0x10] ss:$8 sps:$4 sm:$0xff]   ;;  %v82_v9 = vpack.c.bf16 %v81_v5, %v81_v5 }
  0x4c   :  { %124 = vmatpush1.bf16.msra.mxu0 %v698_v2  ;;  %v702_v6 = vld [vmem:[#allocation7 + $0x4] ss:$8 sps:$4 sm:$0xff]   ;;  %v704_v7 = vld [vmem:[#allocation7] ss:$8 sps:$4 sm:$0xff]   ;;  %v705_v8 = vld [vmem:[#allocation7 + $0x14] ss:$8 sps:$4 sm:$0xff]  }
  0x4d   :  { %125 = vmatprep.subr.bf16.mxu0 %v699_v3  ;;  %372 = vmatprep.subr.bf16.mxu1 %v702_v6  ;;  %v707_v10 = vld [vmem:[#allocation7 + $0x10] ss:$8 sps:$4 sm:$0xff]   ;;  %vm119_vm0 = vcmask 261120   ;;  %v708_v11 = vld [vmem:[#allocation7 + $0x24] ss:$8 sps:$4 sm:$0xff]   ;;  %v90_v52 = vshrl.u32 %v89_v51, 7 }
  0x4e   :  { %373 = vmatpush1.bf16.msra.mxu1 %v704_v7  ;;  %v710_v12 = vld [vmem:[#allocation7 + $0x20] ss:$8 sps:$4 sm:$0xff]   ;;  %v711_v13 = vld [vmem:[#allocation7 + $0x34] ss:$8 sps:$4 sm:$0xff]   ;;  %v713_v14 = vld [vmem:[#allocation7 + $0x30] ss:$8 sps:$4 sm:$0xff]  }
  0x4f   :  { %374 = vmatprep.subr.bf16.mxu1 %v705_v8  ;;  %v714_v15 = vld [vmem:[#allocation7 + $0x44] ss:$8 sps:$4 sm:$0xff]   ;;  %v716_v16 = vld [vmem:[#allocation7 + $0x40] ss:$8 sps:$4 sm:$0xff]   ;;  %v717_v17 = vld [vmem:[#allocation7 + $0x54] ss:$8 sps:$4 sm:$0xff]  }
  0x50   :  { %126 = vmatpush1.bf16.msra.mxu0 %v701_v4  ;;  %v719_v18 = vld [vmem:[#allocation7 + $0x50] ss:$8 sps:$4 sm:$0xff]   ;;  %v720_v19 = vld [vmem:[#allocation7 + $0x64] ss:$8 sps:$4 sm:$0xff]   ;;  %v722_v20 = vld [vmem:[#allocation7 + $0x60] ss:$8 sps:$4 sm:$0xff]  }
  0x51   :  { %v723_v21 = vld [vmem:[#allocation7 + $0x74] ss:$8 sps:$4 sm:$0xff]   ;;  %v725_v22 = vld [vmem:[#allocation7 + $0x70] ss:$8 sps:$4 sm:$0xff]   ;;  %v726_v23 = vld [vmem:[#allocation7 + $0x84] ss:$8 sps:$4 sm:$0xff]  }
  0x52   :  { %375 = vmatpush1.bf16.msra.mxu1 %v707_v10  ;;  %v728_v24 = vld [vmem:[#allocation7 + $0x80] ss:$8 sps:$4 sm:$0xff]   ;;  %v729_v25 = vld [vmem:[#allocation7 + $0x94] ss:$8 sps:$4 sm:$0xff]   ;;  %v731_v26 = vld [vmem:[#allocation7 + $0x90] ss:$8 sps:$4 sm:$0xff]  }
  0x53   :  { %614 = vmatmul.mubr.msk.bf16.vlgmr.msra.gmra.mrb[0].mxu0 %vm119_vm0, %v82_v9  ;;  %376 = vmatprep.subr.bf16.mxu1 %v708_v11  ;;  %v732_v27 = vld [vmem:[#allocation7 + $0xa4] ss:$8 sps:$4 sm:$0xff]   ;;  %v734_v28 = vld [vmem:[#allocation7 + $0xa0] ss:$8 sps:$4 sm:$0xff]   ;;  %v735_v29 = vld [vmem:[#allocation7 + $0xb4] ss:$8 sps:$4 sm:$0xff]  }
  0x54   :  { %v737_v30 = vld [vmem:[#allocation7 + $0xb0] ss:$8 sps:$4 sm:$0xff]   ;;  %v738_v31 = vld [vmem:[#allocation7 + $0xc4] ss:$8 sps:$4 sm:$0xff]   ;;  %v740_v32 = vld [vmem:[#allocation7 + $0xc0] ss:$8 sps:$4 sm:$0xff]  }
  0x55   :  { %v741_v33 = vld [vmem:[#allocation7 + $0xd4] ss:$8 sps:$4 sm:$0xff]   ;;  %v743_v34 = vld [vmem:[#allocation7 + $0xd0] ss:$8 sps:$4 sm:$0xff]   ;;  %v744_v35 = vld [vmem:[#allocation7 + $0xe4] ss:$8 sps:$4 sm:$0xff]  }
  0x56   :  { %377 = vmatpush1.bf16.msra.mxu1 %v710_v12  ;;  %v746_v36 = vld [vmem:[#allocation7 + $0xe0] ss:$8 sps:$4 sm:$0xff]   ;;  %v747_v37 = vld [vmem:[#allocation7 + $0xf4] ss:$8 sps:$4 sm:$0xff]   ;;  %v749_v38 = vld [vmem:[#allocation7 + $0xf0] ss:$8 sps:$4 sm:$0xff]  }
  0x57   :  { %378 = vmatprep.subr.bf16.mxu1 %v711_v13  ;;  %v750_v39 = vld [vmem:[#allocation8 + $0x40] sm:$0xff]   ;;  %v752_v41 = vld [vmem:[#allocation8 + $0x48] sm:$0xff]   ;;  %v754_v43 = vld [vmem:[#allocation8 + $0x50] sm:$0xff]   ;;  %v91_v53 = vsub.s32 0, %v90_v52  ;;  %v95_v55 = vsub.s32 1, %v90_v52 }
  0x58   :  { %v751_v40 = vld [vmem:[#allocation8] sm:$0xff]   ;;  %664 = vmatprep.subr.bf16.mxu0 %v750_v39  ;;  %v753_v42 = vld [vmem:[#allocation8 + $0x8] sm:$0xff]   ;;  %v755_v44 = vld [vmem:[#allocation8 + $0x10] sm:$0xff]  }
  0x59   :  { %665 = vmatpush3.bf16.msra.mxu0 %v751_v40  ;;  %v756_v45 = vld [vmem:[#allocation8 + $0x58] sm:$0xff]   ;;  %v758_v47 = vld [vmem:[#allocation8 + $0x60] sm:$0xff]   ;;  %v760_v49 = vld [vmem:[#allocation8 + $0x68] sm:$0xff]  }
  0x5a   :  { %379 = vmatpush1.bf16.msra.mxu1 %v713_v14  ;;  %666 = vmatprep.subr.bf16.mxu0 %v752_v41  ;;  %v757_v46 = vld [vmem:[#allocation8 + $0x18] sm:$0xff]   ;;  %v759_v48 = vld [vmem:[#allocation8 + $0x20] sm:$0xff]   ;;  %v761_v50 = vld [vmem:[#allocation8 + $0x28] sm:$0xff]  }
  0x5b   :  { %380 = vmatprep.subr.bf16.mxu1 %v714_v15  ;;  %v87_v54 = vld [vmem:[%s1011_s2] sm:$0x3]  ;;  %v762_v4 = vld [vmem:[#allocation8 + $0x70] sm:$0xff]  }
  0x5c   :  { %v92_v56 = vrot.slane %v87_v54, %v91_v53  ;;  %v96_v57 = vrot.slane %v87_v54, %v95_v55  ;;  %v763_v5 = vld [vmem:[#allocation8 + $0x30] sm:$0xff]   ;;  %v764_v6 = vld [vmem:[#allocation8 + $0x78] sm:$0xff]  }
  0x5d   :  { %667 = vmatpush3.bf16.msra.mxu0 %v753_v42  ;;  %v765_v7 = vld [vmem:[#allocation8 + $0x38] sm:$0xff]  }
  0x5e   :  { %381 = vmatpush1.bf16.msra.mxu1 %v716_v16  ;;  %668 = vmatprep.subr.bf16.mxu0 %v754_v43  ;;  %v200_v8 = vld [vmem:[%s1013_s4] sm:$0x3]  ;;  %s893_s4 = smov [#allocation10]  }
  0x5f   :  { %382 = vmatprep.subr.bf16.mxu1 %v717_v17  ;;  %v205_v9 = vrot.slane %v200_v8, %v91_v53  ;;  %v209_v10 = vrot.slane %v200_v8, %v95_v55  ;;  %s599_s30 = sshll.u32 %s893_s4, 4  ;;  %s600_s30 = int_to_ptr.vmem [resolvable:$true] %s599_s30 }
  0x60   :  { %s854_s8 = scalar_lea.vmem %s600_s30, 128  ;;  %p859_p5 = scmp.lt.s32.totalorder %s600_s30, %s600_s30 }
  0x61   :  { %669 = vmatpush3.bf16.msra.mxu0 %v755_v44  ;;  %p855_p4 = scmp.ne.s32.totalorder %s600_s30, %s854_s8  ;;  %p860_p6 = scmp.lt.s32.totalorder %s854_s8, %s854_s8 }
  0x62   :  { %383 = vmatpush1.bf16.msra.mxu1 %v719_v18  ;;  %670 = vmatprep.subr.bf16.mxu0 %v756_v45 }
  0x63   :  { %384 = vmatprep.subr.bf16.mxu1 %v720_v19  ;;  %p861_p7 = por %p860_p6, %p859_p5 }
  0x65   :  { %671 = vmatpush3.bf16.msra.mxu0 %v757_v46  ;;  %p862_p8 = pnand %p861_p7, %p855_p4 }
  0x66   :  { %385 = vmatpush1.bf16.msra.mxu1 %v722_v20  ;;  %672 = vmatprep.subr.bf16.mxu0 %v758_v47 }
  0x67   :  { %386 = vmatprep.subr.bf16.mxu1 %v723_v21 }
  0x69   :  { %673 = vmatpush3.bf16.msra.mxu0 %v759_v48 }
  0x6a   :  { %387 = vmatpush1.bf16.msra.mxu1 %v725_v22  ;;  %674 = vmatprep.subr.bf16.mxu0 %v760_v49  ;;  %v647_v22 = vld [vmem:[%s1015_s6] ss:$0 sm:$0xff] }
  0x6b   :  { %388 = vmatprep.subr.bf16.mxu1 %v726_v23 }
  0x6d   :  { %675 = vmatpush3.bf16.msra.mxu0 %v761_v50 }
  0x6e   :  { %389 = vmatpush1.bf16.msra.mxu1 %v728_v24  ;;  %676 = vmatprep.subr.bf16.mxu0 %v762_v4 }
  0x6f   :  { %390 = vmatprep.subr.bf16.mxu1 %v729_v25 }
  0x71   :  { %677 = vmatpush3.bf16.msra.mxu0 %v763_v5 }
  0x72   :  { %391 = vmatpush1.bf16.msra.mxu1 %v731_v26  ;;  %678 = vmatprep.subr.bf16.mxu0 %v764_v6 }
  0x73   :  { %392 = vmatprep.subr.bf16.mxu1 %v732_v27 }
  0x75   :  { %679 = vmatpush3.bf16.msra.mxu0 %v765_v7 }
  0x76   :  { %393 = vmatpush1.bf16.msra.mxu1 %v734_v28 }
  0x77   :  { %394 = vmatprep.subr.bf16.mxu1 %v735_v29 }
  0x7a   :  { %395 = vmatpush1.bf16.msra.mxu1 %v737_v30 }
  0x7b   :  { %396 = vmatprep.subr.bf16.mxu1 %v738_v31 }
  0x7e   :  { %397 = vmatpush1.bf16.msra.mxu1 %v740_v32 }
  0x7f   :  { %398 = vmatprep.subr.bf16.mxu1 %v741_v33 }
  0x82   :  { %399 = vmatpush1.bf16.msra.mxu1 %v743_v34 }
  0x83   :  { %400 = vmatprep.subr.bf16.mxu1 %v744_v35 }
  0x86   :  { %401 = vmatpush1.bf16.msra.mxu1 %v746_v36 }
  0x87   :  { %402 = vmatprep.subr.bf16.mxu1 %v747_v37 }
  0x8a   :  { %403 = vmatpush1.bf16.msra.mxu1 %v749_v38 }
 0x126   :  { %v157_v58 = vpop.f32.mrb[0].mxu0 }
 0x127   :  { %v158_v59 = vadd.f32 %v157_v58, %v92_v56  ;;  %v159_v60 = vpop.f32.mrb[1].mxu0 }
 0x128   :  { %v160_v61 = vadd.f32 %v159_v60, %v96_v57  ;;  %v161_v62 = vpop.f32.mrb[2].mxu0 }
 0x129   :  { %v164_v63 = vmax.f32 %v158_v59, 0.0  ;;  %v162_v0 = vpop.f32.mrb[3].mxu0 }
 0x12a   :  { %v165_v1 = vmax.f32 %v160_v61, 0.0 }
 0x12b   :  { %v166_v3 = vpack.c.bf16 %v164_v63, %v164_v63 }
 0x12c   :  { %v167_v2 = vpack.c.bf16 %v165_v1, %v165_v1 }
 0x12e   :  { %404 = vmatprep.mubr.bf16.mxu1 %v167_v2 }
 0x12f   :  { %405 = vmatmul.mubr.bf16.vlgmr.msra.gmra.mrb[0].mxu1 %v166_v3 }
 0x202   :  { %v406_v11 = vpop.f32.mrb[0].mxu1 }
 0x203   :  { %v407_v12 = vadd.f32 %v406_v11, %v205_v9  ;;  %v408_v13 = vpop.f32.mrb[1].mxu1 }
 0x204   :  { %v409_v14 = vadd.f32 %v408_v13, %v209_v10  ;;  %v410_v15 = vpop.f32.mrb[2].mxu1 }
 0x205   :  { %v413_v16 = vmax.f32 %v407_v12, 0.0  ;;  %v411_v17 = vpop.f32.mrb[3].mxu1 }
 0x206   :  { %v414_v18 = vmax.f32 %v409_v14, 0.0 }
 0x207   :  { %v415_v20 = vpack.c.bf16 %v413_v16, %v413_v16 }
 0x208   :  { %v416_v19 = vpack.c.bf16 %v414_v18, %v414_v18 }
 0x20a   :  { %584 = vmatprep.mubr.bf16.mxu0 %v416_v19 }
 0x20b   :  { %585 = vmatmul.mubr.bf16.vlgmr.msra.gmra.mrb[4].mxu0 %v415_v20 }
 0x2de   :  { %v680_v21 = vpop.f32.mrb[4].mxu0 }
 0x2df   :  { %v681_v23 = vpop.f32.mrb[5].mxu0 }
 0x2e0   :  { %v682_v24 = vadd.f32 %v681_v23, %v680_v21  ;;  %v683_v25 = vpop.f32.mrb[6].mxu0 }
 0x2e1   :  { %v684_v26 = vpop.f32.mrb[7].mxu0 }
 0x2e2   :  { %v587_v27 = vadd.f32 %v682_v24, %v647_v22 }
 0x2e4   :  { %592 = vst [vmem:[#allocation10] sm:$0xff] %v587_v27 }
 0x2e5   :  { %865 = shalt.err (!%p862_p8)
}
 0x2e6   :  { %s866_s6 = scalar_lea.hbm %s1016_s7, 128 }
 0x2e7   :  { %p867_p9 = scmp.ne.s32.totalorder %s1016_s7, %s866_s6  ;;  %p870_p10 = scmp.lt.u32.totalorder %s866_s6, %s1016_s7 }
 0x2e9   :  { %p872_p11 = pnand %p870_p10, %p867_p9 }
 0x2eb   :  { %875 = shalt.err (!%p872_p11)
}
 0x2ec   :  { %602 = dma.vmem_to_hbm [thread:$0]  %s600_s30, 128, %s1016_s7, [#allocation4]  }
 0x2ed   :  { %882 = dma.done.wait [#allocation4], 128  }
 0x2ee   :  { %883 = vsyncadd [#allocation4], 4294967168 }
 0x2ef   :  { %606 = vsyncpa [#allocation3], 1 }
 0x2f0   :  { %607 = vsyncpa [#allocation6], 1 }
 0x2f1   :  { %608 = vsyncpa [#allocation9], 1 }
 0x2f2   :  { %609 = vsyncpa [#allocation4], 1 }

</bundles_post_ra>
